<compile_context>
chip_gen: v6e
topology: v6e:2x2x1
jax: 0.10.0
libtpu: 0.0.40
codegen_flags: <defaults>
</compile_context>

<pallas_src>
import math
from functools import partial

import jax
import jax.numpy as jnp
from jax.experimental import pallas as pl
from jax.experimental.pallas import tpu as pltpu


# ----------------- kernel 1: per-head fused QKV projection (K-tiled) -----------------
def _qkv_proj_kernel(x_ref, w_ref, b_ref, q_ref, k_ref, v_ref, acc_ref, *, head_dim):
    # x_ref: (tm, tk) bf16;  w_ref: (tk, 3D) bf16 (softmax scale pre-folded into Q cols)
    # b_ref: (1, 3D) f32;    outputs: q/k/v (tm, D);  acc_ref: (tm, 3D) f32
    kk = pl.program_id(3)

    @pl.when(kk == 0)
    def _init():
        acc_ref[...] = jnp.zeros(acc_ref.shape, dtype=acc_ref.dtype)

    acc_ref[...] += jnp.dot(x_ref[...], w_ref[...], preferred_element_type=jnp.float32)

    @pl.when(kk == pl.num_programs(3) - 1)
    def _finalize():
        D = head_dim
        y = acc_ref[...] + b_ref[...]
        q_ref[...] = y[:, 0 * D:1 * D].astype(q_ref.dtype)
        k_ref[...] = y[:, 1 * D:2 * D].astype(k_ref.dtype)
        v_ref[...] = y[:, 2 * D:3 * D].astype(v_ref.dtype)


# --------------------------- kernel 2: flash attention --------------------------------
def _flash_attn_kernel(q_ref, k_ref, v_ref, o_ref, m_sc, l_sc, acc_sc):
    # q_ref: (tq, D); k_ref/v_ref: (tk, D); o_ref: (tq, D) slice of the (B,S,E) slab.
    ki = pl.program_id(3)

    @pl.when(ki == 0)
    def _init():
        m_sc[...] = jnp.full(m_sc.shape, -jnp.inf, dtype=m_sc.dtype)
        l_sc[...] = jnp.zeros(l_sc.shape, dtype=l_sc.dtype)
        acc_sc[...] = jnp.zeros(acc_sc.shape, dtype=acc_sc.dtype)

    cdt = k_ref.dtype
    q = q_ref[...]                                                  # scale already folded in
    k = k_ref[...]
    v = v_ref[...]

    # scores = q @ k^T without an explicit in-kernel transpose.
    s = jax.lax.dot_general(q, k, (((1,), (1,)), ((), ())),
                            preferred_element_type=jnp.float32)     # (tq, tk)

    m_prev = m_sc[...]
    m_new = jnp.maximum(m_prev, jnp.max(s, axis=-1, keepdims=True))
    alpha = jnp.exp(m_prev - m_new)
    p = jnp.exp(s - m_new)
    l_sc[...] = alpha * l_sc[...] + jnp.sum(p, axis=-1, keepdims=True)
    acc_sc[...] = alpha * acc_sc[...] + jnp.dot(
        p.astype(cdt), v, preferred_element_type=jnp.float32)
    m_sc[...] = m_new

    @pl.when(ki == pl.num_programs(3) - 1)
    def _finalize():
        inv_l = pl.reciprocal(l_sc[...], approx=True)
        o_ref[...] = (acc_sc[...] * inv_l).astype(o_ref.dtype)


# --------------------- kernel 3: output projection (M,N,K tiled) ----------------------
def _out_proj_kernel(x_ref, w_ref, b_ref, o_ref, acc_ref):
    # x_ref: (tm, tk) bf16; w_ref: (tk, tn) bf16; b_ref: (1, tn) f32; acc: (tm, tn) f32
    kk = pl.program_id(3)

    @pl.when(kk == 0)
    def _init():
        acc_ref[...] = jnp.zeros(acc_ref.shape, dtype=acc_ref.dtype)

    acc_ref[...] += jnp.dot(x_ref[...], w_ref[...], preferred_element_type=jnp.float32)

    @pl.when(kk == pl.num_programs(3) - 1)
    def _finalize():
        o_ref[...] = (acc_ref[...] + b_ref[...]).astype(o_ref.dtype)


def mha_forward(x, wqkv, bqkv, wout, bout, *, num_heads, softmax_scale=None,
                block_q=512, block_k=512,
                qkv_block_m=256, qkv_block_k=512,
                out_block_m=256, out_block_n=512, out_block_k=512,
                compute_dtype=jnp.bfloat16):
    """x: (B, S, E). wqkv: (3E, E), bqkv: (3E,), wout: (E, E), bout: (E,)."""
    B, S, E = x.shape
    H = num_heads
    assert E % H == 0, "embed_dim must be divisible by num_heads"
    D = E // H
    scale = float(softmax_scale) if softmax_scale is not None else 1.0 / math.sqrt(D)

    tq = min(block_q, S)
    tk = min(block_k, S)
    ptm = min(qkv_block_m, S)
    ptk = min(qkv_block_k, E)
    otm = min(out_block_m, S)
    otn = min(out_block_n, E)
    otk = min(out_block_k, E)
    assert S % tq == 0 and S % tk == 0, "seqlen must divide attention block sizes"
    assert S % ptm == 0 and E % ptk == 0, "dims must divide QKV projection blocks"
    assert S % otm == 0 and E % otn == 0 and E % otk == 0, \
        "dims must divide output projection blocks"

    # ---- one-time wrapper-side weight layout plumbing (no per-token compute) ----
    # Wqkv rows are ordered (three, h, d); build per-head (E, 3D) = [q_h | k_h | v_h]
    # slabs and fold the softmax scale into the Q columns (and Q bias).
    w3 = jnp.asarray(wqkv, jnp.float32).reshape(3, H, D, E)
    w3 = w3.at[0].multiply(scale)
    wqkv_h = jnp.transpose(w3, (1, 3, 0, 2)).reshape(H, E, 3 * D).astype(compute_dtype)
    b3 = jnp.asarray(bqkv, jnp.float32).reshape(3, H, D)
    b3 = b3.at[0].multiply(scale)
    bqkv_h = jnp.transpose(b3, (1, 0, 2)).reshape(H, 1, 3 * D)           # f32

    wout_t = jnp.asarray(wout, jnp.float32).T.astype(compute_dtype)      # (E_in, E_out)
    bout2d = jnp.asarray(bout, jnp.float32).reshape(1, E)

    x_c = x.astype(compute_dtype)   # cast once; halves activation read traffic

    # ---- 1) fused QKV projection -> q, k, v each (B, H, S, D); K-axis reduction ----
    q, k, v = pl.pallas_call(
        partial(_qkv_proj_kernel, head_dim=D),
        out_shape=(jax.ShapeDtypeStruct((B, H, S, D), compute_dtype),) * 3,
        grid_spec=pltpu.PrefetchScalarGridSpec(
            num_scalar_prefetch=0,
            grid=(B, H, S // ptm, E // ptk),
            in_specs=[
                pl.BlockSpec((pl.Squeezed(), ptm, ptk),
                             lambda b, h, i, kk: (b, i, kk)),            # x (B,S,E)
                pl.BlockSpec((pl.Squeezed(), ptk, 3 * D),
                             lambda b, h, i, kk: (h, kk, 0)),            # W (H,E,3D)
                pl.BlockSpec((pl.Squeezed(), 1, 3 * D),
                             lambda b, h, i, kk: (h, 0, 0)),             # b (H,1,3D)
            ],
            out_specs=[
                pl.BlockSpec((pl.Squeezed(), pl.Squeezed(), ptm, D),
                             lambda b, h, i, kk: (b, h, i, 0)),
            ] * 3,
            scratch_shapes=[pltpu.VMEM((ptm, 3 * D), jnp.float32)],
        ),
        compiler_params=pltpu.CompilerParams(
            dimension_semantics=("parallel", "parallel", "parallel", "arbitrary")),
    )(x_c, wqkv_h, bqkv_h)

    # ---- 2) flash attention; context written straight into a (B, S, E) slab ----
    ctx = pl.pallas_call(
        _flash_attn_kernel,
        out_shape=jax.ShapeDtypeStruct((B, S, E), compute_dtype),
        grid_spec=pltpu.PrefetchScalarGridSpec(
            num_scalar_prefetch=0,
            grid=(B, H, S // tq, S // tk),
            in_specs=[
                pl.BlockSpec((pl.Squeezed(), pl.Squeezed(), tq, D),
                             lambda b, h, qi, ki: (b, h, qi, 0)),
                pl.BlockSpec((pl.Squeezed(), pl.Squeezed(), tk, D),
                             lambda b, h, qi, ki: (b, h, ki, 0)),
                pl.BlockSpec((pl.Squeezed(), pl.Squeezed(), tk, D),
                             lambda b, h, qi, ki: (b, h, ki, 0)),
            ],
            # head h lands at lane offset h*D of the fused E dim -> no concat needed
            out_specs=pl.BlockSpec((pl.Squeezed(), tq, D),
                                   lambda b, h, qi, ki: (b, qi, h)),
            scratch_shapes=[
                pltpu.VMEM((tq, 1), jnp.float32),   # running max  m
                pltpu.VMEM((tq, 1), jnp.float32),   # running sum  l
                pltpu.VMEM((tq, D), jnp.float32),   # output accumulator
            ],
        ),
        compiler_params=pltpu.CompilerParams(
            dimension_semantics=("parallel", "parallel", "parallel", "arbitrary")),
    )(q, k, v)

    # ---- 3) output projection: standard (M, N, K)-tiled matmul with K = E ----
    out = pl.pallas_call(
        _out_proj_kernel,
        out_shape=jax.ShapeDtypeStruct((B, S, E), x.dtype),
        grid_spec=pltpu.PrefetchScalarGridSpec(
            num_scalar_prefetch=0,
            grid=(B, S // otm, E // otn, E // otk),
            in_specs=[
                pl.BlockSpec((pl.Squeezed(), otm, otk),
                             lambda b, i, j, kk: (b, i, kk)),            # ctx (B,S,E)
                pl.BlockSpec((otk, otn), lambda b, i, j, kk: (kk, j)),   # WoutT (E,E)
                pl.BlockSpec((1, otn), lambda b, i, j, kk: (0, j)),      # bias (1,E)
            ],
            out_specs=pl.BlockSpec((pl.Squeezed(), otm, otn),
                                   lambda b, i, j, kk: (b, i, j)),
            scratch_shapes=[pltpu.VMEM((otm, otn), jnp.float32)],
        ),
        compiler_params=pltpu.CompilerParams(
            dimension_semantics=("parallel", "parallel", "parallel", "arbitrary")),
    )(ctx, wout_t, bout2d)

    return out


def mha_reference(x, wqkv, bqkv, wout, bout, *, num_heads, softmax_scale=None):
    """Pure-JAX f32 reference mirroring the PyTorch module."""
    B, S, E = x.shape
    D = E // num_heads
    scale = softmax_scale if softmax_scale is not None else 1.0 / math.sqrt(D)
    qkv = jnp.einsum('bse,fe->bsf', x, wqkv) + bqkv                 # (B, S, 3E)
    qkv = qkv.reshape(B, S, 3, num_heads, D)
    q, k, v = qkv[:, :, 0], qkv[:, :, 1], qkv[:, :, 2]              # (B, S, H, D)
    scores = jnp.einsum('bthd,bshd->bhts', q, k) * scale
    attn = jax.nn.softmax(scores, axis=-1)
    ctx = jnp.einsum('bhts,bshd->bthd', attn, v).reshape(B, S, E)
    return jnp.einsum('bse,fe->bsf', ctx, wout) + bout


if __name__ == "__main__":
    # Small deterministic test: batch=2, seq=16, hidden=256, heads=2 (head_dim=128,
    # so every last-dim block is 128-lane aligned).  Tiny tiles so the online-softmax
    # KV loop, the QKV K-reduction and the out-proj N/K tiling all run multiple steps.
    B, S, E, H = 2, 16, 256, 2

    key = jax.random.PRNGKey(0)
    kx, k1, k2, k3, k4 = jax.random.split(key, 5)

    bound = 1.0 / math.sqrt(E)
    x = jax.random.normal(kx, (B, S, E), dtype=jnp.float32)
    wqkv = jax.random.uniform(k1, (3 * E, E), jnp.float32, -bound, bound)
    bqkv = jax.random.uniform(k2, (3 * E,), jnp.float32, -bound, bound)
    wout = jax.random.uniform(k3, (E, E), jnp.float32, -bound, bound)
    bout = jax.random.uniform(k4, (E,), jnp.float32, -bound, bound)

    out = mha_forward(x, wqkv, bqkv, wout, bout, num_heads=H,
                      block_q=8, block_k=8,
                      qkv_block_m=8, qkv_block_k=128,
                      out_block_m=8, out_block_n=128, out_block_k=128)
    out = jax.block_until_ready(out)

    ref = mha_reference(x, wqkv, bqkv, wout, bout, num_heads=H)
    assert out.shape == (B, S, E)
    max_err = float(jnp.max(jnp.abs(out - ref)))
    # bf16 MXU operands (with f32 accumulation) => relaxed tolerance vs f32 ref.
    assert jnp.allclose(out, ref, atol=5e-2, rtol=5e-2), (
        f"mismatch vs reference (max abs err {max_err})")

    print("KERNEL_OK")
</pallas_src>

<mosaic_0001>
module attributes {stable_mosaic.version = 11 : i64} {
  func.func @_qkv_proj_kernel(%arg0: i32, %arg1: i32, %arg2: i32, %arg3: i32, %arg4: memref<1x8x128xbf16, #tpu.memory_space<vmem>>, %arg5: memref<1x128x384xbf16, #tpu.memory_space<vmem>>, %arg6: memref<1x1x384xf32, #tpu.memory_space<vmem>>, %arg7: memref<1x1x8x128xbf16, #tpu.memory_space<vmem>>, %arg8: memref<1x1x8x128xbf16, #tpu.memory_space<vmem>>, %arg9: memref<1x1x8x128xbf16, #tpu.memory_space<vmem>>, %arg10: memref<8x384xf32, #tpu.memory_space<vmem>>) attributes {dimension_semantics = [#tpu.dimension_semantics<parallel>, #tpu.dimension_semantics<parallel>, #tpu.dimension_semantics<parallel>, #tpu.dimension_semantics<arbitrary>], iteration_bounds = array<i64: 2, 2, 2, 2>, scalar_prefetch = 0 : i64, scratch_operands = 1 : i64, tpu.core_type = #tpu.core_type<tc>, window_params = [{transform_indices = @transform_0, window_bounds = array<i64: 1, 8, 128>}, {transform_indices = @transform_1, window_bounds = array<i64: 1, 128, 384>}, {transform_indices = @transform_2, window_bounds = array<i64: 1, 1, 384>}, {transform_indices = @transform_3, window_bounds = array<i64: 1, 1, 8, 128>}, {transform_indices = @transform_4, window_bounds = array<i64: 1, 1, 8, 128>}, {transform_indices = @transform_5, window_bounds = array<i64: 1, 1, 8, 128>}]} {
    %c0_i32 = arith.constant 0 : i32
    %0 = arith.cmpi eq, %arg3, %c0_i32 : i32
    %1 = arith.extui %0 : i1 to i32
    %c0_i32_0 = arith.constant 0 : i32
    %2 = arith.cmpi ne, %1, %c0_i32_0 : i32
    scf.if %2 {
      %cst_11 = arith.constant 0.000000e+00 : f32
      %14 = vector.broadcast %cst_11 : f32 to vector<8x384xf32>
      %c0_12 = arith.constant 0 : index
      %c0_13 = arith.constant 0 : index
      %15 = vector.load %arg10[%c0_12, %c0_13] : memref<8x384xf32, #tpu.memory_space<vmem>>, vector<8x384xf32>
      tpu.vector_store %arg10[%c0_12, %c0_13], %14 {strides = array<i32>} : memref<8x384xf32, #tpu.memory_space<vmem>>, vector<8x384xf32>,
    } else {
    }
    %c0 = arith.constant 0 : index
    %c0_1 = arith.constant 0 : index
    %3 = vector.load %arg10[%c0, %c0_1] : memref<8x384xf32, #tpu.memory_space<vmem>>, vector<8x384xf32>
    %c0_2 = arith.constant 0 : index
    %c0_3 = arith.constant 0 : index
    %c0_4 = arith.constant 0 : index
    %4 = vector.load %arg4[%c0_2, %c0_3, %c0_4] : memref<1x8x128xbf16, #tpu.memory_space<vmem>>, vector<1x8x128xbf16>
    %5 = vector.shape_cast %4 : vector<1x8x128xbf16> to vector<8x128xbf16>
    %c0_5 = arith.constant 0 : index
    %c0_6 = arith.constant 0 : index
    %c0_7 = arith.constant 0 : index
    %6 = vector.load %arg5[%c0_5, %c0_6, %c0_7] : memref<1x128x384xbf16, #tpu.memory_space<vmem>>, vector<1x128x384xbf16>
    %7 = vector.shape_cast %6 : vector<1x128x384xbf16> to vector<128x384xbf16>
    %cst = arith.constant dense<0.000000e+00> : vector<8x384xf32>
    %8 = tpu.matmul %5, %7, %cst {dimension_numbers = #tpu.dot_dimension_numbers<[1], [0], [0], [1], [0, 0, 1, 1], [], []>} : vector<8x128xbf16>, vector<128x384xbf16>, vector<8x384xf32> -> vector<8x384xf32>
    %9 = arith.addf %3, %8 : vector<8x384xf32>
    %c0_8 = arith.constant 0 : index
    %c0_9 = arith.constant 0 : index
    %10 = vector.load %arg10[%c0_8, %c0_9] : memref<8x384xf32, #tpu.memory_space<vmem>>, vector<8x384xf32>
    tpu.vector_store %arg10[%c0_8, %c0_9], %9 {strides = array<i32>} : memref<8x384xf32, #tpu.memory_space<vmem>>, vector<8x384xf32>,
    %c1_i32 = arith.constant 1 : i32
    %11 = arith.cmpi eq, %arg3, %c1_i32 : i32
    %12 = arith.extui %11 : i1 to i32
    %c0_i32_10 = arith.constant 0 : i32
    %13 = arith.cmpi ne, %12, %c0_i32_10 : i32
    scf.if %13 {
      %c0_11 = arith.constant 0 : index
      %c0_12 = arith.constant 0 : index
      %14 = vector.load %arg10[%c0_11, %c0_12] : memref<8x384xf32, #tpu.memory_space<vmem>>, vector<8x384xf32>
      %c0_13 = arith.constant 0 : index
      %c0_14 = arith.constant 0 : index
      %c0_15 = arith.constant 0 : index
      %15 = vector.load %arg6[%c0_13, %c0_14, %c0_15] : memref<1x1x384xf32, #tpu.memory_space<vmem>>, vector<1x1x384xf32>
      %16 = vector.shape_cast %15 : vector<1x1x384xf32> to vector<1x384xf32>
      %17 = vector.broadcast %16 : vector<1x384xf32> to vector<8x384xf32>
      %18 = arith.addf %14, %17 : vector<8x384xf32>
      %19 = vector.extract_strided_slice %18 {offsets = [0, 0], sizes = [8, 128], strides = [1, 1]} : vector<8x384xf32> to vector<8x128xf32>
      %20 = arith.truncf %19 : vector<8x128xf32> to vector<8x128xbf16>
      %c0_16 = arith.constant 0 : index
      %c0_17 = arith.constant 0 : index
      %c0_18 = arith.constant 0 : index
      %c0_19 = arith.constant 0 : index
      %21 = vector.load %arg7[%c0_16, %c0_17, %c0_18, %c0_19] : memref<1x1x8x128xbf16, #tpu.memory_space<vmem>>, vector<1x1x8x128xbf16>
      %22 = vector.shape_cast %21 : vector<1x1x8x128xbf16> to vector<8x128xbf16>
      %23 = vector.shape_cast %20 : vector<8x128xbf16> to vector<1x1x8x128xbf16>
      tpu.vector_store %arg7[%c0_16, %c0_17, %c0_18, %c0_19], %23 {strides = array<i32>} : memref<1x1x8x128xbf16, #tpu.memory_space<vmem>>, vector<1x1x8x128xbf16>,
      %24 = vector.extract_strided_slice %18 {offsets = [0, 128], sizes = [8, 128], strides = [1, 1]} : vector<8x384xf32> to vector<8x128xf32>
      %25 = arith.truncf %24 : vector<8x128xf32> to vector<8x128xbf16>
      %c0_20 = arith.constant 0 : index
      %c0_21 = arith.constant 0 : index
      %c0_22 = arith.constant 0 : index
      %c0_23 = arith.constant 0 : index
      %26 = vector.load %arg8[%c0_20, %c0_21, %c0_22, %c0_23] : memref<1x1x8x128xbf16, #tpu.memory_space<vmem>>, vector<1x1x8x128xbf16>
      %27 = vector.shape_cast %26 : vector<1x1x8x128xbf16> to vector<8x128xbf16>
      %28 = vector.shape_cast %25 : vector<8x128xbf16> to vector<1x1x8x128xbf16>
      tpu.vector_store %arg8[%c0_20, %c0_21, %c0_22, %c0_23], %28 {strides = array<i32>} : memref<1x1x8x128xbf16, #tpu.memory_space<vmem>>, vector<1x1x8x128xbf16>,
      %29 = vector.extract_strided_slice %18 {offsets = [0, 256], sizes = [8, 128], strides = [1, 1]} : vector<8x384xf32> to vector<8x128xf32>
      %30 = arith.truncf %29 : vector<8x128xf32> to vector<8x128xbf16>
      %c0_24 = arith.constant 0 : index
      %c0_25 = arith.constant 0 : index
      %c0_26 = arith.constant 0 : index
      %c0_27 = arith.constant 0 : index
      %31 = vector.load %arg9[%c0_24, %c0_25, %c0_26, %c0_27] : memref<1x1x8x128xbf16, #tpu.memory_space<vmem>>, vector<1x1x8x128xbf16>
      %32 = vector.shape_cast %31 : vector<1x1x8x128xbf16> to vector<8x128xbf16>
      %33 = vector.shape_cast %30 : vector<8x128xbf16> to vector<1x1x8x128xbf16>
      tpu.vector_store %arg9[%c0_24, %c0_25, %c0_26, %c0_27], %33 {strides = array<i32>} : memref<1x1x8x128xbf16, #tpu.memory_space<vmem>>, vector<1x1x8x128xbf16>,
    } else {
    }
    return
  }
  func.func @transform_0(%arg0: i32, %arg1: i32, %arg2: i32, %arg3: i32) -> (i32, i32, i32) {
    %c0_i32 = arith.constant 0 : i32
    return %arg0, %arg2, %arg3 : i32, i32, i32
  }
  func.func @transform_1(%arg0: i32, %arg1: i32, %arg2: i32, %arg3: i32) -> (i32, i32, i32) {
    %c0_i32 = arith.constant 0 : i32
    %c0_i32_0 = arith.constant 0 : i32
    return %arg1, %arg3, %c0_i32 : i32, i32, i32
  }
  func.func @transform_2(%arg0: i32, %arg1: i32, %arg2: i32, %arg3: i32) -> (i32, i32, i32) {
    %c0_i32 = arith.constant 0 : i32
    %c0_i32_0 = arith.constant 0 : i32
    %c0_i32_1 = arith.constant 0 : i32
    return %arg1, %c0_i32, %c0_i32_0 : i32, i32, i32
  }
  func.func @transform_3(%arg0: i32, %arg1: i32, %arg2: i32, %arg3: i32) -> (i32, i32, i32, i32) {
    %c0_i32 = arith.constant 0 : i32
    %c0_i32_0 = arith.constant 0 : i32
    return %arg0, %arg1, %arg2, %c0_i32 : i32, i32, i32, i32
  }
  func.func @transform_4(%arg0: i32, %arg1: i32, %arg2: i32, %arg3: i32) -> (i32, i32, i32, i32) {
    %c0_i32 = arith.constant 0 : i32
    %c0_i32_0 = arith.constant 0 : i32
    return %arg0, %arg1, %arg2, %c0_i32 : i32, i32, i32, i32
  }
  func.func @transform_5(%arg0: i32, %arg1: i32, %arg2: i32, %arg3: i32) -> (i32, i32, i32, i32) {
    %c0_i32 = arith.constant 0 : i32
    %c0_i32_0 = arith.constant 0 : i32
    return %arg0, %arg1, %arg2, %c0_i32 : i32, i32, i32, i32
  }
}

</mosaic_0001>

<bundles_post_ra>
// kernel: tpu_custom_call.1
= control target key start
LH: loop header
LB: loop body
LE: loop exit
PB: predicated region body
PF: predicated region fallthrough
CT: control target
= control target key end

     0   :  { %s2189_s0 = inlined_call_operand.hbm [shape: bf16[2,16,256], index: 0, kind: input, shape index: {}]   ;;  %s2190_s1 = inlined_call_operand.hbm [shape: bf16[2,256,384], index: 1, kind: input, shape index: {}]   ;;  %s2191_s2 = inlined_call_operand.hbm [shape: f32[2,1,384], index: 2, kind: input, shape index: {}]   ;;  %s2192_s3 = inlined_call_operand.hbm [shape: bf16[2,2,16,128], index: 3, kind: output, shape index: {0}]   ;;  %s2193_s4 = inlined_call_operand.hbm [shape: bf16[2,2,16,128], index: 4, kind: output, shape index: {1}]   ;;  %s2194_s5 = inlined_call_operand.hbm [shape: bf16[2,2,16,128], index: 5, kind: output, shape index: {2}]  }
   0x1   :  { %2222 = sst [smem:[#allocation39_spill]] %s2189_s0 }
   0x2   :  { %2223 = sst [smem:[#allocation40_spill]] %s2190_s1 }
   0x3   :  { %2224 = sst [smem:[#allocation41_spill]] %s2191_s2 }
   0x4   :  { %2225 = sst [smem:[#allocation42_spill]] %s2192_s3 }
   0x5   :  { %2226 = sst [smem:[#allocation43_spill]] %s2193_s4 }
   0x6   :  { %2227 = sst [smem:[#allocation44_spill]] %s2194_s5 }
   0x7   :  { %11 = vsyncpa [#allocation4], 0 }
   0x8   :  { %13 = vsyncpa [#allocation4 + $0x1], 0 }
   0x9   :  { %14 = vsyncpa [#allocation7], 0 }
   0xa   :  { %16 = vsyncpa [#allocation7 + $0x1], 0 }
   0xb   :  { %17 = vsyncpa [#allocation5], 0 }
   0xc   :  { %19 = vsyncpa [#allocation5 + $0x1], 0 }
   0xd   :  { %20 = vsyncpa [#allocation11], 0 }
   0xe   :  { %22 = vsyncpa [#allocation11 + $0x1], 0  ;;  %s1680_s18 = smov 0   ;;  %s1682_s19 = smov 0  }
   0xf   :  { %s1684_s20 = smov 0   ;;  %s1686_s21 = smov 0  }
  0x10   :  { %s1688_s22 = smov 0   ;;  %s1690_s23 = smov 0  }
  0x11   :  { %s1692_s24 = smov 0   ;;  %s1694_s25 = smov 0  }
  0x12   :  { %s1696_s26 = smov 0   ;;  %s1698_s27 = smov 0  }
  0x13   :  { %s1700_s28 = smov 0   ;;  %s1702_s29 = smov 0  }
  0x14   :  { %s1704_s30 = smov 0   ;;  %s1706_s6 = smov 0  }
  0x15   :  { %s1708_s7 = smov 0   ;;  %s1710_s8 = smov 0  }
  0x16   :  { %s1712_s9 = smov 0   ;;  %s1714_s10 = smov 0  }
  0x17   :  { %s1716_s11 = smov 0   ;;  %s1718_s12 = smov 0  }
  0x18   :  { %s1720_s13 = smov 0  }
  0x19 LB: > { %2228 = sst [smem:[#allocation18_spill]] %s1556_s18  ;;  %p2214_p0 = scmp.eq.s32.totalorder %s1636_s13, 0  ;;  %s1636_s13 = sphi %s1720_s13, %s28_s13   ;;  %s1632_s12 = sphi %s1718_s12, %s2325_s12   ;;  %s1628_s11 = sphi %s1716_s11, %s2310_s11   ;;  %s1624_s10 = sphi %s1714_s10, %s2324_s10   ;;  %s1620_s9 = sphi %s1712_s9, %s2323_s9   ;;  %s1616_s8 = sphi %s1710_s8, %s2305_s8   ;;  %s1612_s7 = sphi %s1708_s7, %s2322_s7   ;;  %s1608_s6 = sphi %s1706_s6, %s2321_s6   ;;  %s1604_s30 = sphi %s1704_s30, %s2320_s30   ;;  %s1600_s29 = sphi %s1702_s29, %s2319_s29   ;;  %s1596_s28 = sphi %s1700_s28, %s2318_s28   ;;  %s1592_s27 = sphi %s1698_s27, %s2317_s27   ;;  %s1588_s26 = sphi %s1696_s26, %s2316_s26   ;;  %s1584_s25 = sphi %s1694_s25, %s2315_s25   ;;  %s1580_s24 = sphi %s1692_s24, %s2314_s24   ;;  %s1576_s23 = sphi %s1690_s23, %s2312_s23   ;;  %s1572_s22 = sphi %s1688_s22, %s2299_s22   ;;  %s1568_s21 = sphi %s1686_s21, %s2298_s21   ;;  %s1564_s20 = sphi %s1684_s20, %s2309_s20   ;;  %s1560_s19 = sphi %s1682_s19, %s2307_s19   ;;  %s1556_s18 = sphi %s1680_s18, %s2297_s18  }
  0x1a   : > { %2229 = sst [smem:[#allocation19_spill]] %s1560_s19  ;;  %p100_p1 = scmp.ne.s32.totalorder %s1588_s26, %s1584_s25 }
  0x1b   : > { %2230 = sst [smem:[#allocation20_spill]] %s1568_s21  ;;  %p106_p2 = scmp.ne.s32.totalorder %s1584_s25, %s1580_s24 }
  0x1c   : > { %2231 = sst [smem:[#allocation21_spill]] %s1572_s22  ;;  %p1080_p3 = scmp.lt.s32.totalorder %s1636_s13, 16 }
  0x1d   : > { %2232 = sst [smem:[#allocation22_spill]] %s1576_s23  ;;  %p102_p4 = por %p100_p1, %p2214_p0 }
  0x1e   : > { %2233 = sst [smem:[#allocation23_spill]] %s1588_s26  ;;  %s268_s15 = sand.u32 1, %s1636_s13  }
  0x1f   : > { %2234 = sst [smem:[#allocation24_spill]] %s1600_s29  ;;  %s270_s16 = sand.u32 1, %s1588_s26  }
  0x20   : > { %2235 = sst [smem:[#allocation25_spill]] %s1604_s30  ;;  %s1041_s17 = smul.u32 192, %s270_s16 }
  0x21   : > { %2236 = sst [smem:[#allocation26_spill]] %s1608_s6  ;;  %p1798_p5 = pnand %p1080_p3, %p102_p4 }
  0x22   : > { %2237 = sst [smem:[#allocation27_spill]] %s1612_s7  ;;  %s1042_s3 = smul.u32 48, %s1620_s9 }
  0x23   : > { %2238 = sst [smem:[#allocation28_spill]] %s1616_s8  ;;  %s1043_s4 = smul.u32 96, %s1628_s11 }
  0x24   : > { %2239 = sst [smem:[#allocation29_spill]] %s1628_s11  ;;  %s272_s8 = scalar_lea.vmem [#allocation6], %s1041_s17 }
  0x25   : > { %2240 = sst [smem:[#allocation30_spill]] %s1632_s12  ;;  %s282_s6 = sshll.u32 %s272_s8, 4  ;;  %s283_s6 = int_to_ptr.vmem [resolvable:$true] %s282_s6 }
  0x26   : > { %s279_s14 = sadd.s32 %s1043_s4, %s1042_s3  ;;  %s2242_s1 = sld [smem:[#allocation40_spill]] }
  0x27   : > { %s965_s7 = sshll.u32 %s279_s14, 6  ;;  %p967_p6 = scmp.ge.s32.totalorder %s1636_s13, 1 }
  0x28   : > { %s1808_s22 = scalar_lea.sflag [#allocation7], %s268_s15  ;;  %p1290_p7 = pneg %p1798_p5 }
  0x29   : > { %s1301_s16 = scalar_lea.vmem %s283_s6, 3072  ;;  %s1638_s23 = smov [#allocation6]  }
  0x2a   : > { %p1302_p8 = scmp.ne.s32.totalorder %s283_s6, %s1301_s16  ;;  %s1306_s0 = sshll.u32 %s1638_s23, 4  ;;  %s1307_s0 = int_to_ptr.vmem [resolvable:$false] %s1306_s0 }
  0x2b   : > { %s1308_s8 = scalar_lea.vmem %s1307_s0, 6144  ;;  %p1309_p11 = scmp.lt.s32.totalorder %s283_s6, %s1307_s0 }
  0x2c   : > { %s281_s21 = scalar_lea.hbm %s2242_s1, %s965_s7  ;;  %p1304_p9 = pnand %p1302_p8, %p1290_p7 }
  0x2d   : > { %p1310_p12 = scmp.lt.s32.totalorder %s1308_s8, %s1301_s16 }
  0x2e   : > { %p1305_p10 = pneg %p1304_p9 }
  0x2f   : > { %p1311_p13 = por %p1310_p12, %p1309_p11 }
  0x31   : > { %p1312_p1 = pnand %p1311_p13, %p1305_p10 }
  0x33   : > { %1315 = shalt.err (!%p1312_p1)
}
  0x34   : > { %s1639_s2 = smov 192   ;;  %s1640_s0 = smov 12  }
  0x35   : > { %1066 = dma.hbm_to_vmem [thread:$0]  (!%p1798_p5), %s281_s21, 3072, %s283_s6, %s1808_s22, %s1639_s2, %s1639_s2, %s1640_s0  }
  0x36   : > { %p309_p4 = scmp.lt.s32.totalorder %s1636_s13, 17  ;;  %s1823_s4 = sadd.s32 4294967295, %s1636_s13  }
  0x37   : > { %s43_s30 = sadd.s32 1, %s1620_s9  ;;  %s46_s7 = sadd.s32 1, %s1624_s10 }
  0x38   : > { %p1818_p7 = pnand %p967_p6, %p309_p4  ;;  %p44_p8 = scmp.ge.s32.totalorder %s43_s30, 2 }
  0x39   : > { %s50_s5 = sadd.s32 1, %s1628_s11  ;;  %s54_s21 = sadd.s32 1, %s1632_s12 }
  0x3a   : > { %s2327_s30 = smov (%p44_p8, %s43_s30), 0  ;;  %s2329_s7 = smov (!%p44_p8, %s46_s7), %s1624_s10 }
  0x3b   : > { %2244 = sst [smem:[#allocation31_spill]] %s2327_s30  ;;  %s61_s14 = ssub.s32 %s1620_s9, %s2327_s30 }
  0x3c   : > { %p72_p5 = scmp.ne.s32.totalorder %s1600_s29, %s1596_s28  ;;  %p48_p6 = scmp.ge.s32.totalorder %s2329_s7, 2 }
  0x3d   : > { %p78_p9 = scmp.ne.s32.totalorder %s1596_s28, %s1592_s27  ;;  %p2205_p11 = scmp.eq.s32.totalorder %s1823_s4, 0 }
  0x3e   : > { %p1842_p10 = por %p2214_p0, %p72_p5  ;;  %s2331_s7 = smov (%p48_p6, %s2329_s7), 0 }
  0x3f   : > { %2246 = sst [smem:[#allocation32_spill]] %s2331_s7  ;;  %s2333_s5 = smov (!%p48_p6, %s50_s5), %s1628_s11 }
  0x40   : > { %s59_s17 = ssub.s32 %s1624_s10, %s2331_s7  ;;  %p1854_p12 = por %p2205_p11, %p78_p9 }
  0x41   : > { %p52_p13 = scmp.ge.s32.totalorder %s2333_s5, 2  ;;  %p1863_p1 = por %p106_p2, %p2205_p11 }
  0x42   : > { %s149_s8 = sadd.s32 1, %s1564_s20  ;;  %p159_p4 = scmp.ne.s32.totalorder %s1564_s20, %s1560_s19 }
  0x43   : > { %s2248_s27 = scalar_select %p1863_p1, 1, 0 }
  0x44   : > { %s2335_s5 = smov (%p52_p13, %s2333_s5), 0  ;;  %s2337_s21 = smov (!%p52_p13, %s54_s21), %s1632_s12 }
  0x45   : > { %2249 = sst [smem:[#allocation33_spill]] %s2248_s27  ;;  %s1875_s2 = ssub.s32 %s1628_s11, %s2335_s5 }
  0x46   : > { %2250 = sst [smem:[#allocation34_spill]] %s2335_s5  ;;  %p160_p8 = scmp.eq.s32.totalorder %s1823_s4, 15 }
  0x47   : > { %p56_p5 = scmp.ge.s32.totalorder %s2337_s21, 2  ;;  %s90_s24 = sor.u32 %s1875_s2, %s61_s14 }
  0x48   : > { %p91_p2 = scmp.eq.s32.totalorder %s90_s24, 0  ;;  %s2253_s6 = sadd.s32 1, %s1588_s26 }
  0x49   : > { %s2339_s21 = smov (%p56_p5, %s2337_s21), 0  ;;  %p1889_p9 = por %p160_p8, %p159_p4 }
  0x4a   : > { %2251 = sst [smem:[#allocation35_spill]] %s2339_s21  ;;  %s2252_s0 = smov %s2339_s21 }
  0x4b   : > { %s1885_s23 = scalar_select %p91_p2, %s1588_s26, %s2253_s6  }
  0x4c   : > { %s58_s1 = ssub.s32 %s1632_s12, %s2252_s0  ;;  %p165_p5 = scmp.ne.s32.totalorder %s1560_s19, %s1556_s18 }
  0x4d   : > { %2254 = sst [smem:[#allocation36_spill]] %s1885_s23  ;;  %s60_s7 = sor.u32 %s59_s17, %s58_s1 }
  0x4e   : > { %s2255_s5 = scalar_select %p1889_p9, 1, 0 }
  0x4f   : > { %s144_s30 = sor.u32 %s1875_s2, %s58_s1  ;;  %s62_s27 = sor.u32 %s61_s14, %s60_s7 }
  0x50   : > { %2256 = sst [smem:[#allocation37_spill]] %s2255_s5  ;;  %s146_s24 = sor.u32 %s144_s30, %s59_s17 }
  0x51   : > { %p63_p13 = scmp.eq.s32.totalorder %s62_s27, 0  ;;  %p147_p11 = scmp.eq.s32.totalorder %s146_s24, 0 }
  0x52   : > { %s2257_s21 = sadd.s32 4294967294, %s1636_s13   ;;  %s2258_s6 = sadd.s32 1, %s1600_s29 }
  0x53   : > { %p166_p2 = scmp.eq.s32.totalorder %s2257_s21, 15  ;;  %s246_s5 = sand.u32 1, %s1600_s29  }
  0x54   : > { %s1901_s23 = scalar_select %p63_p13, %s1600_s29, %s2258_s6  }
  0x55   : > { %s1904_s0 = scalar_select %p147_p11, %s1564_s20, %s149_s8  }
  0x56   : > { %2259 = sst [smem:[#allocation38_spill]] %s1901_s23  ;;  %p1906_p4 = por %p166_p2, %p165_p5 }
  0x57   : > { %s959_s1 = sshll.u32 %s246_s5, 2  ;;  %s960_s7 = sshll.u32 %s1624_s10, 1 }
  0x58   : > { %s2260_s26 = scalar_select %p1906_p4, 1, 0 }
  0x59   : > { %s255_s30 = sadd.s32 %s1620_s9, %s960_s7  ;;  %s961_s14 = sshll.u32 %s1632_s12, 2 }
  0x5a   : > { %s257_s17 = sadd.s32 %s961_s14, %s255_s30  ;;  %s250_s27 = scalar_lea.vmem [#allocation3], %s959_s1 }
  0x5b   : > { %s261_s24 = sshll.u32 %s250_s27, 4  ;;  %s962_s18 = sshll.u32 %s257_s17, 6  ;;  %s262_s24 = int_to_ptr.vmem [resolvable:$true] %s261_s24 }
  0x5c   : > { %s2261_s6 = sld [smem:[#allocation39_spill]]  ;;  %p1921_p11 = pnand %p1080_p3, %p1842_p10 }
  0x5d   : > { %s247_s29 = scalar_lea.sflag [#allocation4], %s246_s5  ;;  %s1329_s7 = scalar_lea.vmem %s262_s24, 64 }
  0x5e   : > { %p1318_p8 = pneg %p1921_p11  ;;  %p1330_p13 = scmp.ne.s32.totalorder %s262_s24, %s1329_s7 }
  0x5f   : > { %s1641_s1 = smov [#allocation3]  }
  0x60   : > { %p1332_p5 = pnand %p1330_p13, %p1318_p8  ;;  %s1334_s30 = sshll.u32 %s1641_s1, 4  ;;  %s1335_s30 = int_to_ptr.vmem [resolvable:$false] %s1334_s30 }
  0x61   : > { %s1336_s14 = scalar_lea.vmem %s1335_s30, 128  ;;  %p1337_p0 = scmp.lt.s32.totalorder %s262_s24, %s1335_s30 }
  0x62   : > { %s259_s23 = scalar_lea.hbm %s2261_s6, %s962_s18  ;;  %p1333_p2 = pneg %p1332_p5 }
  0x63   : > { %p1338_p6 = scmp.lt.s32.totalorder %s1336_s14, %s1329_s7 }
  0x65   : > { %p1339_p4 = por %p1338_p6, %p1337_p0 }
  0x67   : > { %p1340_p9 = pnand %p1339_p4, %p1333_p2 }
  0x69   : > { %1343 = shalt.err (!%p1340_p9)
}
  0x6a   : > { %s2263_s18 = sld [smem:[#allocation22_spill]]  ;;  %p2266_p10 = scmp.eq.s32.totalorder %s1875_s2, 0 }
  0x6b   : > { %s2264_s19 = sld [smem:[#allocation21_spill]]  ;;  %s1045_s21 = smul.u32 48, %s1628_s11 }
  0x6c   : > { %s2265_s5 = sld [smem:[#allocation20_spill]]  ;;  %p2267_p9 = scmp.eq.s32.totalorder %s1636_s13, 0 }
  0x6d   : > { %1063 = dma.hbm_to_vmem [thread:$0]  (!%p1921_p11), %s259_s23, 64, %s262_s24, %s247_s29  }
  0x6e   : > { %p2268_p8 = scmp.eq.s32.totalorder %s1823_s4, 0  ;;  %s2271_s2 = sld [smem:[#allocation41_spill]] }
  0x70   : > { %s119_s15 = sadd.s32 1, %s2263_s18  ;;  %s294_s27 = sand.u32 1, %s2263_s18  }
  0x71   : > { %s1933_s17 = scalar_select %p2266_p10, %s2263_s18, %s119_s15  }
  0x72   : > { %p126_p0 = scmp.ne.s32.totalorder %s2263_s18, %s2264_s19  ;;  %p132_p6 = scmp.ne.s32.totalorder %s2264_s19, %s2265_s5 }
  0x73   : > { %s1044_s8 = smul.u32 3, %s294_s27  ;;  %s1642_s18 = smov [#allocation8]  }
  0x74   : > { %p128_p4 = por %p126_p0, %p2267_p9  ;;  %p1945_p13 = por %p132_p6, %p2268_p8 }
  0x75   : > { %s302_s24 = scalar_lea.hbm %s2271_s2, %s1045_s21  ;;  %s296_s1 = scalar_lea.vmem [#allocation8], %s1044_s8 }
  0x76   : > { %p1951_p5 = pnand %p1080_p3, %p128_p4  ;;  %s304_s30 = sshll.u32 %s296_s1, 4  ;;  %s305_s30 = int_to_ptr.vmem [resolvable:$true] %s304_s30 }
  0x77   : > { %s1357_s14 = scalar_lea.vmem %s305_s30, 48  ;;  %s1362_s19 = sshll.u32 %s1642_s18, 4  ;;  %s1363_s19 = int_to_ptr.vmem [resolvable:$false] %s1362_s19 }
  0x78   : > { %p1346_p11 = pneg %p1951_p5  ;;  %p1358_p2 = scmp.ne.s32.totalorder %s305_s30, %s1357_s14 }
  0x79   : > { %s1364_s5 = scalar_lea.vmem %s1363_s19, 96  ;;  %p1365_p3 = scmp.lt.s32.totalorder %s305_s30, %s1363_s19 }
  0x7a   : > { %p1360_p10 = pnand %p1358_p2, %p1346_p11  ;;  %p1366_p6 = scmp.lt.s32.totalorder %s1364_s5, %s1357_s14 }
  0x7c   : > { %p1361_p0 = pneg %p1360_p10  ;;  %p1367_p9 = por %p1366_p6, %p1365_p3 }
  0x7e   : > { %p1368_p4 = pnand %p1367_p9, %p1361_p0 }
  0x80   : > { %1371 = shalt.err (!%p1368_p4)
}
  0x81   : > { %1069 = dma.hbm_to_vmem [thread:$0]  (!%p1951_p5), %s302_s24, 48, %s305_s30, %s1808_s22  }
  0x82   : > { %313 = sbr.rel (%p1818_p7) target bundleno = 497 (0x1f1), region = 32  ;;  %s315_s15 = sand.u32 (!%p1818_p7), 1, %s1596_s28  }
  0x83   : > { %s1966_s27 = sshll.u32 (!%p1818_p7), %s315_s15, 2  ;;  %s316_s21 = scalar_lea.sflag (!%p1818_p7), [#allocation4], %s315_s15 }
  0x84   : > { %s319_s8 = scalar_lea.vmem (!%p1818_p7), [#allocation3], %s1966_s27 }
  0x87   : > { %1535 = dma.done.wait (%p1854_p12), %s316_s21, 64  }
  0x88   : > { %1537 = vsyncadd (%p1854_p12), %s316_s21, 4294967232  ;;  %s324_s7 = sand.u32 1, %s1823_s4   ;;  %s326_s3 = sand.u32 1, %s1584_s25  }
  0x89   : > { %s1046_s29 = smul.u32 192, %s326_s3  ;;  %s325_s23 = scalar_lea.sflag [#allocation7], %s324_s7 }
  0x8b   : > { %s1977_s2 = scalar_lea.vmem [#allocation6], %s1046_s29 }
  0x8c   : > { %1539 = dma.done.wait (%p1863_p1), %s325_s23, 3072  }
  0x8d   : > { %1541 = vsyncadd (%p1863_p1), %s325_s23, 4294964224  ;;  %s2273_s24 = sld [smem:[#allocation21_spill]] }
  0x93   : > { %s335_s16 = sand.u32 1, %s2273_s24  }
  0x94   : > { %s1984_s1 = smul.u32 3, %s335_s16 }
  0x96   : > { %s337_s30 = scalar_lea.vmem [#allocation8], %s1984_s1 }
  0x97   : > { %1543 = dma.done.wait (%p1945_p13), %s325_s23, 48  }
  0x98   : > { %1545 = vsyncadd (%p1945_p13), %s325_s23, 4294967248  ;;  %s2274_s14 = sld [smem:[#allocation19_spill]] }
  0x99   : > { %s2275_s22 = sld [smem:[#allocation25_spill]] }
  0x9e   : > { %s2218_s18 = sand.u32 1, %s2274_s14  }
  0x9f   : > { %s1994_s19 = sshll.u32 %s2218_s18, 2  ;;  %p972_p7 = scmp.ne.s32.totalorder %s2275_s22, 0 }
  0xa0   : > { %s2216_s5 = scalar_lea.vmem [#allocation9], %s1994_s19  ;;  %s376_s15 = scalar_lea.vmem [#allocation10], %s1994_s19 }
  0xa1   : > { %s2217_s21 = scalar_lea.vmem [#allocation12], %s1994_s19  ;;  %389 = sbr.rel (%p972_p7) target bundleno = 169 (0xa9), region = 48 }
  0xa6   : > { %v1643_v0 = vmov 0.0  }
  0xa7   : > { %390 = vst [vmem:[#allocation2 + $0x10] sm:$0xff] %v1643_v0  ;;  %391 = vst [vmem:[#allocation2] sm:$0xff] %v1643_v0 }
  0xa8   : > { %392 = vst [vmem:[#allocation2 + $0x8] sm:$0xff] %v1643_v0 }
  0xa9 PF: > { %v1256_v1 = vld [vmem:[%s1977_s2 + $0xac] ss:$12 sps:$4 sm:$0xff]   ;;  %v1644_v2 = vmov 0.0   ;;  %v1258_v3 = vld [vmem:[%s1977_s2 + $0xb0] ss:$12 sps:$4 sm:$0xff]   ;;  %vm1645_vm0 = vmmov 0  }
  0xaa   : > { %1021 = vmatprep.subr.bf16.mxu1 %v1644_v2  ;;  %1037 = vmatprep.mubr.msk.bf16.mxu1 %vm1645_vm0, %v1644_v2  ;;  %v1259_v4 = vld [vmem:[%s1977_s2 + $0xa8] ss:$12 sps:$4 sm:$0xff]   ;;  %v1646_v6 = vmov 0   ;;  %v1262_v7 = vld [vmem:[%s1977_s2 + $0x98] ss:$12 sps:$4 sm:$0xff]   ;;  %s2276_s6 = sld [smem:[#allocation25_spill]] }
  0xab   : > { %557 = vmatprep.subr.bf16.mxu0 %v1256_v1  ;;  %1022 = vmatpush3.bf16.msra.mxu1 %v1258_v3  ;;  %v1260_v5 = vld [vmem:[%s1977_s2 + $0x94] ss:$12 sps:$4 sm:$0xff]   ;;  %v1263_v8 = vld [vmem:[%s1977_s2 + $0x90] ss:$12 sps:$4 sm:$0xff]   ;;  %v1267_v11 = vld [vmem:[%s1977_s2 + $0x78] ss:$12 sps:$4 sm:$0xff]  }
  0xac   : > { %589 = vmatprep.mubr.bf16.mxu0 %v1646_v6  ;;  %558 = vmatpush1.bf16.msra.mxu0 %v1259_v4  ;;  %v1264_v9 = vld [vmem:[%s1977_s2 + $0x7c] ss:$12 sps:$4 sm:$0xff]   ;;  %v1266_v10 = vld [vmem:[%s1977_s2 + $0x80] ss:$12 sps:$4 sm:$0xff]   ;;  %v1268_v12 = vld [vmem:[%s1977_s2 + $0x64] ss:$12 sps:$4 sm:$0xff]  }
  0xad   : > { %1023 = vmatprep.subr.bf16.mxu1 %v1644_v2  ;;  %559 = vmatprep.subr.bf16.mxu0 %v1260_v5  ;;  %v1270_v13 = vld [vmem:[%s1977_s2 + $0x68] ss:$12 sps:$4 sm:$0xff]   ;;  %v1271_v14 = vld [vmem:[%s1977_s2 + $0x60] ss:$12 sps:$4 sm:$0xff]   ;;  %v1274_v16 = vld [vmem:[%s1977_s2 + $0x50] ss:$12 sps:$4 sm:$0xff]  }
  0xae   : > { %v1272_v15 = vld [vmem:[%s1977_s2 + $0x4c] ss:$12 sps:$4 sm:$0xff]   ;;  %v1275_v17 = vld [vmem:[%s1977_s2 + $0x48] ss:$12 sps:$4 sm:$0xff]   ;;  %v1279_v20 = vld [vmem:[%s1977_s2 + $0x30] ss:$12 sps:$4 sm:$0xff]  }
  0xaf   : > { %1024 = vmatpush3.bf16.msra.mxu1 %v1262_v7  ;;  %v1276_v18 = vld [vmem:[%s1977_s2 + $0x34] ss:$12 sps:$4 sm:$0xff]   ;;  %v1278_v19 = vld [vmem:[%s1977_s2 + $0x38] ss:$12 sps:$4 sm:$0xff]   ;;  %v1280_v21 = vld [vmem:[%s1977_s2 + $0x1c] ss:$12 sps:$4 sm:$0xff]  }
  0xb0   : > { %560 = vmatpush1.bf16.msra.mxu0 %v1263_v8  ;;  %1025 = vmatprep.subr.bf16.mxu1 %v1644_v2  ;;  %v1282_v22 = vld [vmem:[%s1977_s2 + $0x20] ss:$12 sps:$4 sm:$0xff]   ;;  %v1283_v23 = vld [vmem:[%s1977_s2 + $0x18] ss:$12 sps:$4 sm:$0xff]   ;;  %v1286_v25 = vld [vmem:[%s1977_s2 + $0x8] ss:$12 sps:$4 sm:$0xff]  }
  0xb1   : > { %561 = vmatprep.subr.bf16.mxu0 %v1264_v9  ;;  %v1284_v24 = vld [vmem:[%s1977_s2 + $0x4] ss:$12 sps:$4 sm:$0xff]   ;;  %v1287_v26 = vld [vmem:[%s1977_s2] ss:$12 sps:$4 sm:$0xff]   ;;  %v396_v27 = vld [vmem:[%s319_s8] sm:$0xf] }
  0xb2   : > { %v395_v28 = vld [vmem:[#allocation2 + $0x8] sm:$0xff]  ;;  %v393_v29 = vld [vmem:[#allocation2 + $0x10] sm:$0xff]  ;;  %v394_v33 = vld [vmem:[#allocation2] sm:$0xff]  ;;  %p997_p12 = scmp.ne.s32.totalorder %s2276_s6, 1 }
  0xb3   : > { %1026 = vmatpush3.bf16.msra.mxu1 %v1266_v10 }
  0xb4   : > { %562 = vmatpush1.bf16.msra.mxu0 %v1267_v11  ;;  %1027 = vmatprep.subr.bf16.mxu1 %v1644_v2 }
  0xb5   : > { %563 = vmatprep.subr.bf16.mxu0 %v1268_v12 }
  0xb7   : > { %1028 = vmatpush3.bf16.msra.mxu1 %v1270_v13 }
  0xb8   : > { %564 = vmatpush1.bf16.msra.mxu0 %v1271_v14  ;;  %1029 = vmatprep.subr.bf16.mxu1 %v1644_v2 }
  0xb9   : > { %565 = vmatprep.subr.bf16.mxu0 %v1272_v15 }
  0xbb   : > { %1030 = vmatpush3.bf16.msra.mxu1 %v1274_v16 }
  0xbc   : > { %566 = vmatpush1.bf16.msra.mxu0 %v1275_v17  ;;  %1031 = vmatprep.subr.bf16.mxu1 %v1644_v2 }
  0xbd   : > { %567 = vmatprep.subr.bf16.mxu0 %v1276_v18 }
  0xbf   : > { %1032 = vmatpush3.bf16.msra.mxu1 %v1278_v19 }
  0xc0   : > { %568 = vmatpush1.bf16.msra.mxu0 %v1279_v20  ;;  %1033 = vmatprep.subr.bf16.mxu1 %v1644_v2 }
  0xc1   : > { %569 = vmatprep.subr.bf16.mxu0 %v1280_v21 }
  0xc3   : > { %1034 = vmatpush3.bf16.msra.mxu1 %v1282_v22 }
  0xc4   : > { %570 = vmatpush1.bf16.msra.mxu0 %v1283_v23  ;;  %1035 = vmatprep.subr.bf16.mxu1 %v1644_v2 }
  0xc5   : > { %571 = vmatprep.subr.bf16.mxu0 %v1284_v24 }
  0xc7   : > { %1036 = vmatpush3.bf16.msra.mxu1 %v1286_v25 }
  0xc8   : > { %572 = vmatpush1.bf16.msra.mxu0 %v1287_v26 }
  0xca   : > { %1038 = vmatmul.mubr.bf16.vlgmr.msra.gmra.mxu1 %v396_v27 }
  0xcb   : > { %590 = vmatmul.mubr.bf16.vlgmr.msra.gmra.mxu0 %v396_v27 }
 0x18a   : > { %v632_v30 = vpop.f32.mrf.mxu1 }
 0x18b   : > { %v640_v31 = vadd.f32 %v632_v30, %v395_v28  ;;  %v591_v32 = vpop.f32.mrf.mxu0 }
 0x18c   : > { %v638_v34 = vadd.f32 %v591_v32, %v393_v29  ;;  %v1039_v35 = vpop.f32.mrf.mxu1 }
 0x18d   : > { %643 = vst [vmem:[#allocation2 + $0x8] sm:$0xff] %v640_v31  ;;  %v593_v36 = vpop.f32.mrf.mxu0  ;;  %647 = sbr.rel (%p997_p12) target bundleno = 416 (0x1a0), region = 52 }
 0x18e   : > { %641 = vst [vmem:[#allocation2 + $0x10] sm:$0xff] %v638_v34  ;;  %v639_v37 = vadd.f32 %v593_v36, %v394_v33  ;;  %v635_v38 = vpop.f32.mrf.mxu1 }
 0x18f   : > { %v595_v39 = vpop.f32.mrf.mxu0 }
 0x190   : > { %642 = vst [vmem:[#allocation2] sm:$0xff] %v639_v37  ;;  %v1040_v40 = vpop.f32.mrf.mxu1 }
 0x191   : > { %v596_v41 = vpop.f32.mrf.mxu0 }
 0x192   : > { %v653_v42 = vlaneseq  ;;  %v651_v44 = vld [vmem:[%s337_s30] sm:$0x7] }
 0x194   : > { %v654_v43 = vshrl.u32 %v653_v42, 7  ;;  %v650_v50 = vld [vmem:[#allocation2 + $0x8] sm:$0xff] }
 0x195   : > { %v648_v48 = vld [vmem:[#allocation2 + $0x10] sm:$0xff] }
 0x196   : > { %v655_v45 = vsub.s32 0, %v654_v43  ;;  %v659_v46 = vsub.s32 1, %v654_v43  ;;  %v663_v47 = vsub.s32 2, %v654_v43 }
 0x197   : > { %v649_v49 = vld [vmem:[#allocation2] sm:$0xff] }
 0x198   : > { %v656_v51 = vrot.slane %v651_v44, %v655_v45  ;;  %v660_v52 = vrot.slane %v651_v44, %v659_v46  ;;  %v664_v53 = vrot.slane %v651_v44, %v663_v47 }
 0x19a   : > { %v668_v54 = vadd.f32 %v656_v51, %v648_v48  ;;  %v669_v55 = vadd.f32 %v660_v52, %v649_v49  ;;  %v670_v56 = vadd.f32 %v664_v53, %v650_v50 }
 0x19c   : > { %v671_v57 = vpack.c.bf16 %v668_v54, %v668_v54  ;;  %v673_v58 = vpack.c.bf16 %v669_v55, %v669_v55  ;;  %v675_v59 = vpack.c.bf16 %v670_v56, %v670_v56 }
 0x19e   : > { %672 = vst [vmem:[%s2216_s5] sm:$0xf] %v671_v57  ;;  %674 = vst [vmem:[%s376_s15] sm:$0xf] %v673_v58 }
 0x19f   : > { %676 = vst [vmem:[%s2217_s21] sm:$0xf] %v675_v59 }
 0x1a0 PF: > { %s2277_s27 = sld [smem:[#allocation27_spill]]  ;;  %s722_s1 = sshll.u32 %s376_s15, 4  ;;  %s723_s1 = int_to_ptr.vmem [resolvable:$true] %s722_s1 }
 0x1a1   : > { %s2278_s8 = sld [smem:[#allocation26_spill]]  ;;  %s2048_s18 = scalar_lea.sflag [#allocation11], %s324_s7 }
 0x1a2   : > { %s2279_s3 = sld [smem:[#allocation28_spill]]  ;;  %s1372_s12 = scalar_lea.vmem %s723_s1, 64 }
 0x1a3   : > { %s2280_s29 = sld [smem:[#allocation37_spill]]  ;;  %p1373_p1 = scmp.ne.s32.totalorder %s723_s1, %s1372_s12 }
 0x1a4   : > { %s2281_s6 = sld [smem:[#allocation43_spill]] }
 0x1a6   : > { %s1001_s23 = sshll.u32 %s2277_s27, 1  ;;  %s1647_s27 = smov [#allocation10]  }
 0x1a7   : > { %s699_s2 = sadd.s32 %s2278_s8, %s1001_s23  ;;  %s1376_s8 = sshll.u32 %s1647_s27, 4  ;;  %s1377_s8 = int_to_ptr.vmem [resolvable:$false] %s1376_s8 }
 0x1a8   : > { %s1002_s24 = sshll.u32 %s2279_s3, 2  ;;  %s1378_s15 = scalar_lea.vmem %s1377_s8, 128 }
 0x1a9   : > { %s701_s16 = sadd.s32 %s1002_s24, %s699_s2  ;;  %p2283_p8 = scmp.ne.s32.totalorder %s2280_s29, 0 }
 0x1aa   : > { %s2040_s30 = sshll.u32 %s701_s16, 6  ;;  %s2282_s5 = smov %s2281_s6 }
 0x1ab   : > { %s720_s21 = scalar_lea.hbm %s2281_s6, %s2040_s30  ;;  %p1374_p13 = pnand %p1373_p1, %p2283_p8 }
 0x1ac   : > { %p1379_p11 = scmp.lt.s32.totalorder %s723_s1, %s1377_s8  ;;  %p1380_p2 = scmp.lt.s32.totalorder %s1378_s15, %s1372_s12 }
 0x1ad   : > { %p1375_p5 = pneg %p1374_p13 }
 0x1ae   : > { %p1381_p10 = por %p1380_p2, %p1379_p11 }
 0x1b0   : > { %p1382_p0 = pnand %p1381_p10, %p1375_p5 }
 0x1b2   : > { %1385 = shalt.err (!%p1382_p0)
}
 0x1b3   : > { %s1386_s3 = scalar_lea.hbm %s720_s21, 64  ;;  %s1390_s23 = scalar_lea.hbm %s2282_s5, 512 }
 0x1b4   : > { %p1387_p3 = scmp.ne.s32.totalorder %s720_s21, %s1386_s3  ;;  %p1391_p4 = scmp.lt.s32.totalorder %s720_s21, %s2282_s5 }
 0x1b5   : > { %p1392_p7 = scmp.lt.s32.totalorder %s1390_s23, %s1386_s3 }
 0x1b6   : > { %p1388_p6 = pnand %p1387_p3, %p2283_p8 }
 0x1b7   : > { %p1393_p12 = por %p1392_p7, %p1391_p4 }
 0x1b8   : > { %p1389_p9 = pneg %p1388_p6 }
 0x1ba   : > { %p1394_p1 = pnand %p1393_p12, %p1389_p9 }
 0x1bc   : > { %1397 = shalt.err (!%p1394_p1)
}
 0x1bd   : > { %s2284_s12 = sld [smem:[#allocation19_spill]]  ;;  %s2287_s27 = scalar_lea.vmem [#allocation9], %s1994_s19 }
 0x1be   : > { %1055 = dma.vmem_to_hbm [thread:$0]  (%p2283_p8), %s723_s1, 64, %s720_s21, %s2048_s18  }
 0x1bf   : > { %s2285_s22 = sld [smem:[#allocation42_spill]]  ;;  %s705_s8 = sshll.u32 %s2287_s27, 4  ;;  %s706_s8 = int_to_ptr.vmem [resolvable:$true] %s705_s8 }
 0x1c0   : > { %s2288_s7 = sld [smem:[#allocation44_spill]]  ;;  %s1398_s11 = scalar_lea.vmem %s706_s8, 64 }
 0x1c1   : > { %p1399_p13 = scmp.ne.s32.totalorder %s706_s8, %s1398_s11  ;;  %s1648_s21 = smov [#allocation9]  }
 0x1c2   : > { %s1402_s1 = sshll.u32 %s1648_s21, 4  ;;  %s1403_s1 = int_to_ptr.vmem [resolvable:$false] %s1402_s1 }
 0x1c3   : > { %s2290_s24 = sand.u32 1, %s2284_s12   ;;  %p1400_p5 = pnand %p1399_p13, %p2283_p8 }
 0x1c4   : > { %s678_s5 = scalar_lea.sflag [#allocation5], %s2290_s24  ;;  %s1404_s16 = scalar_lea.vmem %s1403_s1, 128 }
 0x1c5   : > { %s2286_s15 = smov %s2285_s22  ;;  %s2067_s6 = scalar_lea.hbm %s2285_s22, %s2040_s30 }
 0x1c6   : > { %s2289_s2 = smov %s2288_s7  ;;  %s2075_s23 = scalar_lea.hbm %s2288_s7, %s2040_s30 }
 0x1c7   : > { %p1401_p11 = pneg %p1400_p5  ;;  %p1405_p2 = scmp.lt.s32.totalorder %s706_s8, %s1403_s1 }
 0x1c8   : > { %p1406_p10 = scmp.lt.s32.totalorder %s1404_s16, %s1398_s11 }
 0x1ca   : > { %p1407_p0 = por %p1406_p10, %p1405_p2 }
 0x1cc   : > { %p1408_p3 = pnand %p1407_p0, %p1401_p11 }
 0x1ce   : > { %1411 = shalt.err (!%p1408_p3)
}
 0x1cf   : > { %s1412_s30 = scalar_lea.hbm %s2067_s6, 64  ;;  %s1416_s22 = scalar_lea.hbm %s2286_s15, 512 }
 0x1d0   : > { %p1413_p6 = scmp.ne.s32.totalorder %s2067_s6, %s1412_s30  ;;  %p1417_p7 = scmp.lt.s32.totalorder %s2067_s6, %s2286_s15 }
 0x1d1   : > { %p1418_p12 = scmp.lt.s32.totalorder %s1416_s22, %s1412_s30 }
 0x1d2   : > { %p1414_p9 = pnand %p1413_p6, %p2283_p8 }
 0x1d3   : > { %p1419_p1 = por %p1418_p12, %p1417_p7 }
 0x1d4   : > { %p1415_p4 = pneg %p1414_p9 }
 0x1d6   : > { %p1420_p13 = pnand %p1419_p1, %p1415_p4 }
 0x1d8   : > { %1423 = shalt.err (!%p1420_p13)
}
 0x1d9   : > { %1054 = dma.vmem_to_hbm [thread:$0]  (%p2283_p8), %s706_s8, 64, %s2067_s6, %s678_s5  }
 0x1da   : > { %s2291_s11 = scalar_lea.vmem [#allocation12], %s1994_s19  ;;  %s1649_s24 = smov [#allocation12]  }
 0x1db   : > { %s739_s4 = sshll.u32 %s2291_s11, 4  ;;  %s1428_s21 = sshll.u32 %s1649_s24, 4  ;;  %s740_s4 = int_to_ptr.vmem [resolvable:$true] %s739_s4  ;;  %s1429_s21 = int_to_ptr.vmem [resolvable:$false] %s1428_s21 }
 0x1dc   : > { %s1424_s7 = scalar_lea.vmem %s740_s4, 64  ;;  %s1430_s1 = scalar_lea.vmem %s1429_s21, 128 }
 0x1dd   : > { %p1425_p5 = scmp.ne.s32.totalorder %s740_s4, %s1424_s7  ;;  %p1431_p10 = scmp.lt.s32.totalorder %s740_s4, %s1429_s21 }
 0x1de   : > { %p1432_p0 = scmp.lt.s32.totalorder %s1430_s1, %s1424_s7 }
 0x1df   : > { %p1426_p11 = pnand %p1425_p5, %p2283_p8 }
 0x1e0   : > { %p1433_p3 = por %p1432_p0, %p1431_p10 }
 0x1e1   : > { %p1427_p2 = pneg %p1426_p11 }
 0x1e3   : > { %p1434_p6 = pnand %p1433_p3, %p1427_p2 }
 0x1e5   : > { %1437 = shalt.err (!%p1434_p6)
}
 0x1e6   : > { %s1438_s19 = scalar_lea.hbm %s2075_s23, 64  ;;  %s1442_s8 = scalar_lea.hbm %s2289_s2, 512 }
 0x1e7   : > { %p1439_p9 = scmp.ne.s32.totalorder %s2075_s23, %s1438_s19  ;;  %p1443_p12 = scmp.lt.s32.totalorder %s2075_s23, %s2289_s2 }
 0x1e8   : > { %p1444_p1 = scmp.lt.s32.totalorder %s1442_s8, %s1438_s19 }
 0x1e9   : > { %p1440_p4 = pnand %p1439_p9, %p2283_p8 }
 0x1ea   : > { %p1445_p13 = por %p1444_p1, %p1443_p12 }
 0x1eb   : > { %p1441_p7 = pneg %p1440_p4 }
 0x1ed   : > { %p1446_p5 = pnand %p1445_p13, %p1441_p7 }
 0x1ef   : > { %1449 = shalt.err (!%p1446_p5)
}
 0x1f0   : > { %1056 = dma.vmem_to_hbm [thread:$0]  (%p2283_p8), %s740_s4, 64, %s2075_s23, %s2048_s18  }
 0x1f1 PF: > { %s2292_s12 = sld [smem:[#allocation18_spill]]  ;;  %p1081_p11 = scmp.ge.s32.totalorder %s1636_s13, 2 }
 0x1f2   : > { %p2293_p2 = scmp.ne.s32.totalorder %s2260_s26, 0 }
 0x1f4   : > { %p1071_p10 = pnand %p1081_p11, %p2293_p2 }
 0x1f6   : > { %p1072_p0 = pneg %p1071_p10 }
 0x1f7   : > { %s751_s14 = sand.u32 1, %s2292_s12  }
 0x1f8   : > { %s752_s22 = scalar_lea.sflag [#allocation5], %s751_s14 }
 0x1f9   : > { %1547 = dma.done.wait (%p1072_p0), %s752_s22, 64  }
 0x1fa   : > { %1549 = vsyncadd (%p1072_p0), %s752_s22, 4294967232  ;;  %s2294_s27 = sadd.s32 4294967294, %s1636_s13  }
 0x1fb   : > { %s760_s3 = sand.u32 1, %s2294_s27  }
 0x1fc   : > { %s761_s11 = scalar_lea.sflag [#allocation11], %s760_s3 }
 0x1fd   : > { %1551 = dma.done.wait (%p1072_p0), %s761_s11, 128  }
 0x1fe   : > { %1553 = vsyncadd (%p1072_p0), %s761_s11, 4294967168  ;;  %s28_s13 = sadd.s32 1, %s1636_s13   ;;  %s2297_s18 = sld [smem:[#allocation19_spill]] }
 0x1ff   : > { %p2121_p8 = scmp.ge.s32.totalorder %s28_s13, 18   ;;  %s2298_s21 = sld [smem:[#allocation21_spill]] }
 0x200   : > { %s2299_s22 = sld [smem:[#allocation22_spill]]  ;;  %s2307_s19 = smov %s1564_s20 }
 0x201   : > { %s2300_s26 = sld [smem:[#allocation23_spill]]  ;;  %s2309_s20 = smov %s1904_s0 }
 0x202   : > { %s2301_s4 = sld [smem:[#allocation36_spill]]  ;;  %s2312_s23 = smov %s1933_s17 }
 0x203   : > { %s2302_s7 = sld [smem:[#allocation24_spill]]  ;;  %s2314_s24 = smov %s1584_s25 }
 0x204   : > { %s2303_s1 = sld [smem:[#allocation38_spill]]  ;;  %s2317_s27 = smov %s1596_s28 }
 0x205   : > { %s2304_s5 = sld [smem:[#allocation29_spill]]  ;;  %s2320_s30 = smov %s1620_s9 }
 0x206   : > { %s2305_s8 = sld [smem:[#allocation30_spill]]  ;;  %s2321_s6 = smov %s1624_s10 }
 0x207   : > { %s2306_s16 = sld [smem:[#allocation31_spill]]  ;;  %s2315_s25 = smov %s2300_s26 }
 0x208   : > { %s2308_s12 = sld [smem:[#allocation32_spill]]  ;;  %s2316_s26 = smov %s2301_s4 }
 0x209   : > { %s2310_s11 = sld [smem:[#allocation34_spill]]  ;;  %s2318_s28 = smov %s2302_s7 }
 0x20a   : > { %s2311_s14 = sld [smem:[#allocation35_spill]]  ;;  %s2319_s29 = smov %s2303_s1 }
 0x20b   : > { %s2322_s7 = smov %s2304_s5 }
 0x20c   :  { %27 = sbr.rel (!%p2121_p8) target bundleno = 25 (0x19), region = 141 }
 0x20d   : > { %s2323_s9 = smov %s2306_s16 }
 0x20e   : > { %s2324_s10 = smov %s2308_s12 }
 0x210   : > { %s2325_s12 = smov %s2311_s14 }
 0x211   :  { %775 = vsyncpa [#allocation4], 1 }
 0x212   :  { %777 = vsyncpa [#allocation4 + $0x1], 1 }
 0x213   :  { %778 = vsyncpa [#allocation7], 1 }
 0x214   :  { %780 = vsyncpa [#allocation7 + $0x1], 1 }
 0x215   :  { %781 = vsyncpa [#allocation5], 1 }
 0x216   :  { %783 = vsyncpa [#allocation5 + $0x1], 1 }
 0x217   :  { %784 = vsyncpa [#allocation11], 1 }
 0x218   :  { %786 = vsyncpa [#allocation11 + $0x1], 1 }

</bundles_post_ra>
